<compile_context>
chip_gen: v7x
topology: tpu7x:2x2x1
jax: 0.10.0
libtpu: 0.0.40
codegen_flags: <defaults>
</compile_context>

<pallas_src>
import functools

import jax
import jax.numpy as jnp
from jax.experimental import pallas as pl
from jax.experimental.pallas import tpu as pltpu

_LANES = 128
_SUBLANES = 8


def _cdiv(a, b):
    return (a + b - 1) // b


def _round_up(a, b):
    return _cdiv(a, b) * b


def _dice_kernel(logits_ref, target_ref, out_ref, *, num_classes, masked,
                 row_tile, valid_pixels, tiles_per_split):
    """One grid step processes one (C, row_tile, 128) pixel tile of one image.

    logits_ref: (C, R, 128)  float -- logits, pixels on (sublane, lane)
    target_ref: (R, 128)     int8  -- class index per pixel (-1 = padding)
    out_ref:    (2C, 8, 128) f32   -- per-(image, split) accumulator:
                                      rows [0, C)   partial intersection
                                      rows [C, 2C)  partial cardinality
    """
    C = num_classes
    R = row_tile
    t = pl.program_id(2)

    @pl.when(t == 0)
    def _():
        out_ref[...] = jnp.zeros_like(out_ref)

    def fold(a):
        # (R, 128) -> (8, 128): pure vreg-wise VPU adds, no cross-sublane XLU.
        return jnp.sum(a.reshape(R // _SUBLANES, _SUBLANES, _LANES), axis=0)

    def accumulate(use_mask):
        tgt = target_ref[...].astype(jnp.int32)                   # (R, 128)
        xs = [logits_ref[c].astype(jnp.float32) for c in range(C)]
        if use_mask:
            valid = tgt >= 0                                      # -1 = padding
            zeros = jnp.zeros_like(xs[0])
            # NaN-safe: padded rows of the logits block are never read as-is.
            xs = [jnp.where(valid, x, zeros) for x in xs]

        # Channel softmax as unrolled elementwise ops over the C slabs:
        # dense (8,128) vregs, VPU max/add + EUP exp, no sublane reduce.
        m = xs[0]
        for c in range(1, C):
            m = jnp.maximum(m, xs[c])
        es = [jnp.exp(x - m) for x in xs]
        denom = es[0]
        for c in range(1, C):
            denom = denom + es[c]
        inv = pl.reciprocal(denom, approx=True)                   # EUP vrcp
        inv = inv * (2.0 - denom * inv)                           # 1 Newton step
        if use_mask:
            # Exact zero probability on padded pixels: cardinality then needs
            # no per-class mask multiply (hit is already 0 there).
            inv = jnp.where(valid, inv, jnp.zeros_like(inv))

        inters = []
        cards = []
        for c in range(C):
            p_c = es[c] * inv                                     # softmax prob
            hit = (tgt == c).astype(jnp.float32)                  # one-hot slab
            inters.append(fold(p_c * hit))
            cards.append(fold(p_c + hit))                         # merged psum+hsum
        update = jnp.stack(inters + cards, axis=0)                # (2C, 8, 128)
        out_ref[...] = out_ref[...] + update                      # one full-block RMW

    if masked:
        gt = pl.program_id(1) * tiles_per_split + t               # global tile id
        ragged_here = (gt + 1) * (R * _LANES) > valid_pixels

        @pl.when(ragged_here)
        def _():
            accumulate(True)

        @pl.when(jnp.logical_not(ragged_here))
        def _():
            accumulate(False)
    else:
        accumulate(False)


def _pick_tiling(rows128, num_classes, logit_itemsize, batch,
                 max_rows_per_tile=None):
    """Choose (row_tile, num_tiles, n_split, vmem_limit_bytes)."""
    try:
        vmem_cap = int(pltpu.get_tpu_info().vmem_capacity_bytes)
    except Exception:
        vmem_cap = 64 * 1024 * 1024            # v7x per-core VMEM (smallest gen)

    # Rough per-row VMEM model: double-buffered input DMA buffers plus the
    # kernel's f32 elementwise temporaries (~2C + 8 tile-sized slabs).
    in_bytes = _LANES * (num_classes * logit_itemsize + 1)        # logits + i8 tgt
    tmp_bytes = _LANES * 4 * (2 * num_classes + 8)
    per_row = 2 * in_bytes + tmp_bytes

    budget = (vmem_cap * 30) // 100
    cap = budget // per_row
    # Multiple of 32 (int8/bf16 tilings); returns flatten past ~1K rows.
    cap = max(32, min(1024, (cap // 32) * 32))
    if max_rows_per_tile is not None:
        cap = max(32, min(cap, (max_rows_per_tile // 32) * 32))

    vmem_limit = max(32 * 1024 * 1024,
                     min(48 * 1024 * 1024, (vmem_cap * 3) // 4))

    num_tiles = _cdiv(rows128, cap)
    # With a single image, split the pixel reduction in two so both v7x
    # TensorCores get work; harmless on single-core v5e/v6e (just one extra
    # tiny accumulator slab).
    n_split = 2 if (batch == 1 and num_tiles >= 2) else 1
    num_tiles = _round_up(num_tiles, n_split)
    # Rebalance: spread rows evenly over the tile count so the padded tail is
    # at most a few rows instead of up to a whole tile.
    row_tile = _round_up(_cdiv(rows128, num_tiles), 32)
    num_tiles = _round_up(_cdiv(rows128, row_tile), n_split)
    return row_tile, num_tiles, n_split, int(vmem_limit)


def dice_loss(logits, target, eps: float = 1e-7, *, max_rows_per_tile=None):
    """logits: (N, C, H, W) float; target: (N, H, W) integer class indices."""
    N, C, H, W = logits.shape
    HW = H * W
    rows128 = _cdiv(HW, _LANES)
    hw128 = rows128 * _LANES

    row_tile, num_tiles, n_split, vmem_limit = _pick_tiling(
        rows128, C, jnp.dtype(logits.dtype).itemsize, N, max_rows_per_tile)
    tiles_per_split = num_tiles // n_split
    rows_pad = num_tiles * row_tile
    masked = rows_pad * _LANES != HW

    tgt_dtype = jnp.int8 if C <= 127 else jnp.int32
    logits_flat = logits.reshape(N, C, HW)                        # free reshape
    target_flat = target.reshape(N, HW).astype(tgt_dtype)

    if hw128 != HW:
        # TODO(synk): this lane pad copies the logits once in HBM; it could be
        # avoided with an in-kernel per-lane iota mask at the cost of a few
        # extra VPU ops per tile.  Only hit when H*W is not a multiple of 128.
        logits_flat = jnp.pad(logits_flat, ((0, 0), (0, 0), (0, hw128 - HW)))
    if masked:
        # Only the 1-byte/pixel target is padded out to the tile grid; the
        # logits' ragged tail is read as a partial block and masked in-kernel.
        target_flat = jnp.pad(target_flat,
                              ((0, 0), (0, rows_pad * _LANES - HW)),
                              constant_values=-1)

    logits_4d = logits_flat.reshape(N, C, rows128, _LANES)
    target_3d = target_flat.reshape(N, rows_pad, _LANES)

    last_block = max(_cdiv(rows128, row_tile) - 1, 0)

    def logits_map(n, s, t):
        gt = s * tiles_per_split + t
        # Clamp so a (rare) fully-padded tail tile never issues a fully
        # out-of-bounds DMA; its contribution is zeroed via the target mask.
        return (n, 0, jnp.minimum(gt, last_block), 0)

    def target_map(n, s, t):
        return (n, s * tiles_per_split + t, 0)

    def out_map(n, s, t):
        return (n, s, 0, 0, 0)

    acc = pl.pallas_call(
        functools.partial(
            _dice_kernel, num_classes=C, masked=masked, row_tile=row_tile,
            valid_pixels=HW, tiles_per_split=tiles_per_split),
        out_shape=jax.ShapeDtypeStruct((N, n_split, 2 * C, _SUBLANES, _LANES),
                                       jnp.float32),
        grid_spec=pltpu.PrefetchScalarGridSpec(
            num_scalar_prefetch=0,
            grid=(N, n_split, tiles_per_split),
            in_specs=[
                pl.BlockSpec((pl.Squeezed(), C, row_tile, _LANES), logits_map),
                pl.BlockSpec((pl.Squeezed(), row_tile, _LANES), target_map),
            ],
            out_specs=pl.BlockSpec(
                (pl.Squeezed(), pl.Squeezed(), 2 * C, _SUBLANES, _LANES),
                out_map),
        ),
        compiler_params=pltpu.CompilerParams(
            dimension_semantics=("parallel", "parallel", "arbitrary"),
            vmem_limit_bytes=vmem_limit,
        ),
    )(logits_4d, target_3d)

    inter = jnp.sum(acc[:, :, :C], axis=(0, 1, 3, 4))             # (C,)
    card = jnp.sum(acc[:, :, C:], axis=(0, 1, 3, 4))              # (C,)
    return 1.0 - jnp.mean(2.0 * inter / (card + eps))


def _dice_loss_ref(logits, target, eps: float = 1e-7):
    """Pure-JAX reference mirroring the PyTorch module."""
    C = logits.shape[1]
    one_hot = jax.nn.one_hot(target, C, dtype=logits.dtype)       # (N,H,W,C)
    one_hot = jnp.transpose(one_hot, (0, 3, 1, 2))                # (N,C,H,W)
    probs = jax.nn.softmax(logits, axis=1)
    dims = (0, 2, 3)
    inter = jnp.sum(probs * one_hot, axis=dims)
    card = jnp.sum(probs + one_hot, axis=dims)
    return 1.0 - jnp.mean(2.0 * inter / (card + eps))


if __name__ == "__main__":
    key = jax.random.PRNGKey(0)
    k1, k2 = jax.random.split(key)

    # 1) Primary case (exercises the ragged/masked tail: 2 valid rows in a
    #    32-row tile, partial boundary block on the logits).
    N, C, H, W = 2, 4, 16, 16
    logits = jax.random.normal(k1, (N, C, H, W), dtype=jnp.float32)
    target = jax.random.randint(k2, (N, H, W), 0, C, dtype=jnp.int32)
    out = jax.block_until_ready(dice_loss(logits, target))
    ref = jax.block_until_ready(_dice_loss_ref(logits, target))
    assert jnp.allclose(out, ref, atol=1e-5, rtol=1e-5), (out, ref)

    # 2) H*W not a multiple of 128 (lane-pad path).
    k3, k4 = jax.random.split(k1)
    logits2 = jax.random.normal(k3, (1, 3, 17, 19), dtype=jnp.float32)
    target2 = jax.random.randint(k4, (1, 17, 19), 0, 3, dtype=jnp.int32)
    out2 = jax.block_until_ready(dice_loss(logits2, target2))
    ref2 = jax.block_until_ready(_dice_loss_ref(logits2, target2))
    assert jnp.allclose(out2, ref2, atol=1e-5, rtol=1e-5), (out2, ref2)

    # 3) Multi-tile accumulation + two-way core split (N == 1, small forced tile).
    k5, k6 = jax.random.split(k2)
    logits3 = jax.random.normal(k5, (1, 3, 128, 128), dtype=jnp.float32)
    target3 = jax.random.randint(k6, (1, 128, 128), 0, 3, dtype=jnp.int32)
    out3 = jax.block_until_ready(dice_loss(logits3, target3, max_rows_per_tile=32))
    ref3 = jax.block_until_ready(_dice_loss_ref(logits3, target3))
    assert jnp.allclose(out3, ref3, atol=1e-5, rtol=1e-5), (out3, ref3)

    print("KERNEL_OK")
</pallas_src>

<mosaic_0001>
module attributes {stable_mosaic.version = 11 : i64} {
  func.func @_dice_kernel(%arg0: i32, %arg1: i32, %arg2: i32, %arg3: memref<1x4x32x128xf32, #tpu.memory_space<vmem>>, %arg4: memref<1x32x128xi8, #tpu.memory_space<vmem>>, %arg5: memref<1x1x8x8x128xf32, #tpu.memory_space<vmem>>) attributes {dimension_semantics = [#tpu.dimension_semantics<parallel>, #tpu.dimension_semantics<parallel>, #tpu.dimension_semantics<arbitrary>], iteration_bounds = array<i64: 2, 1, 1>, scalar_prefetch = 0 : i64, scratch_operands = 0 : i64, tpu.core_type = #tpu.core_type<tc>, window_params = [{transform_indices = @transform_0, window_bounds = array<i64: 1, 4, 32, 128>}, {transform_indices = @transform_1, window_bounds = array<i64: 1, 32, 128>}, {transform_indices = @transform_2, window_bounds = array<i64: 1, 1, 8, 8, 128>}]} {
    %c0_i32 = arith.constant 0 : i32
    %0 = arith.cmpi eq, %arg2, %c0_i32 : i32
    %1 = arith.extui %0 : i1 to i32
    %c0_i32_0 = arith.constant 0 : i32
    %2 = arith.cmpi ne, %1, %c0_i32_0 : i32
    scf.if %2 {
      %cst = arith.constant 0.000000e+00 : f32
      %13 = vector.broadcast %cst : f32 to vector<8x8x128xf32>
      %c0 = arith.constant 0 : index
      %c0_4 = arith.constant 0 : index
      %c0_5 = arith.constant 0 : index
      %c0_6 = arith.constant 0 : index
      %c0_7 = arith.constant 0 : index
      %14 = vector.load %arg5[%c0, %c0_4, %c0_5, %c0_6, %c0_7] : memref<1x1x8x8x128xf32, #tpu.memory_space<vmem>>, vector<1x1x8x8x128xf32>
      %15 = vector.shape_cast %14 : vector<1x1x8x8x128xf32> to vector<8x8x128xf32>
      %16 = vector.shape_cast %13 : vector<8x8x128xf32> to vector<1x1x8x8x128xf32>
      tpu.vector_store %arg5[%c0, %c0_4, %c0_5, %c0_6, %c0_7], %16 {strides = array<i32>} : memref<1x1x8x8x128xf32, #tpu.memory_space<vmem>>, vector<1x1x8x8x128xf32>,
    } else {
    }
    %c1_i32 = arith.constant 1 : i32
    %3 = arith.muli %arg1, %c1_i32 : i32
    %4 = arith.addi %3, %arg2 : i32
    %c1_i32_1 = arith.constant 1 : i32
    %5 = arith.addi %4, %c1_i32_1 : i32
    %c4096_i32 = arith.constant 4096 : i32
    %6 = arith.muli %5, %c4096_i32 : i32
    %c256_i32 = arith.constant 256 : i32
    %7 = arith.cmpi sgt, %6, %c256_i32 : i32
    %8 = arith.extui %7 : i1 to i32
    %c0_i32_2 = arith.constant 0 : i32
    %9 = arith.cmpi ne, %8, %c0_i32_2 : i32
    scf.if %9 {
      %c0 = arith.constant 0 : index
      %c0_4 = arith.constant 0 : index
      %c0_5 = arith.constant 0 : index
      %13 = vector.load %arg4[%c0, %c0_4, %c0_5] : memref<1x32x128xi8, #tpu.memory_space<vmem>>, vector<1x32x128xi8>
      %14 = vector.shape_cast %13 : vector<1x32x128xi8> to vector<32x128xi8>
      %15 = arith.extsi %14 : vector<32x128xi8> to vector<32x128xi32>
      %c0_6 = arith.constant 0 : index
      %c0_7 = arith.constant 0 : index
      %c0_8 = arith.constant 0 : index
      %c0_9 = arith.constant 0 : index
      %16 = vector.load %arg3[%c0_6, %c0_7, %c0_8, %c0_9] : memref<1x4x32x128xf32, #tpu.memory_space<vmem>>, vector<1x1x32x128xf32>
      %17 = vector.shape_cast %16 : vector<1x1x32x128xf32> to vector<32x128xf32>
      %c0_10 = arith.constant 0 : index
      %c1 = arith.constant 1 : index
      %c0_11 = arith.constant 0 : index
      %c0_12 = arith.constant 0 : index
      %18 = vector.load %arg3[%c0_10, %c1, %c0_11, %c0_12] : memref<1x4x32x128xf32, #tpu.memory_space<vmem>>, vector<1x1x32x128xf32>
      %19 = vector.shape_cast %18 : vector<1x1x32x128xf32> to vector<32x128xf32>
      %c0_13 = arith.constant 0 : index
      %c2 = arith.constant 2 : index
      %c0_14 = arith.constant 0 : index
      %c0_15 = arith.constant 0 : index
      %20 = vector.load %arg3[%c0_13, %c2, %c0_14, %c0_15] : memref<1x4x32x128xf32, #tpu.memory_space<vmem>>, vector<1x1x32x128xf32>
      %21 = vector.shape_cast %20 : vector<1x1x32x128xf32> to vector<32x128xf32>
      %c0_16 = arith.constant 0 : index
      %c3 = arith.constant 3 : index
      %c0_17 = arith.constant 0 : index
      %c0_18 = arith.constant 0 : index
      %22 = vector.load %arg3[%c0_16, %c3, %c0_17, %c0_18] : memref<1x4x32x128xf32, #tpu.memory_space<vmem>>, vector<1x1x32x128xf32>
      %23 = vector.shape_cast %22 : vector<1x1x32x128xf32> to vector<32x128xf32>
      %c0_i32_19 = arith.constant 0 : i32
      %24 = vector.broadcast %c0_i32_19 : i32 to vector<32x128xi32>
      %25 = arith.cmpi sge, %15, %24 : vector<32x128xi32>
      %cst = arith.constant 0.000000e+00 : f32
      %26 = vector.broadcast %cst : f32 to vector<32x128xf32>
      %27 = arith.select %25, %17, %26 : vector<32x128xi1>, vector<32x128xf32>
      %28 = arith.select %25, %19, %26 : vector<32x128xi1>, vector<32x128xf32>
      %29 = arith.select %25, %21, %26 : vector<32x128xi1>, vector<32x128xf32>
      %30 = arith.select %25, %23, %26 : vector<32x128xi1>, vector<32x128xf32>
      %31 = arith.maximumf %27, %28 : vector<32x128xf32>
      %32 = arith.maximumf %31, %29 : vector<32x128xf32>
      %33 = arith.maximumf %32, %30 : vector<32x128xf32>
      %34 = arith.subf %27, %33 : vector<32x128xf32>
      %35 = math.exp %34 : vector<32x128xf32>
      %36 = arith.subf %28, %33 : vector<32x128xf32>
      %37 = math.exp %36 : vector<32x128xf32>
      %38 = arith.subf %29, %33 : vector<32x128xf32>
      %39 = math.exp %38 : vector<32x128xf32>
      %40 = arith.subf %30, %33 : vector<32x128xf32>
      %41 = math.exp %40 : vector<32x128xf32>
      %42 = arith.addf %35, %37 : vector<32x128xf32>
      %43 = arith.addf %42, %39 : vector<32x128xf32>
      %44 = arith.addf %43, %41 : vector<32x128xf32>
      %45 = tpu.reciprocal %44 {approx = true} : vector<32x128xf32> -> vector<32x128xf32>
      %46 = arith.mulf %44, %45 : vector<32x128xf32>
      %cst_20 = arith.constant 2.000000e+00 : f32
      %47 = vector.broadcast %cst_20 : f32 to vector<32x128xf32>
      %48 = arith.subf %47, %46 : vector<32x128xf32>
      %49 = arith.mulf %45, %48 : vector<32x128xf32>
      %cst_21 = arith.constant 0.000000e+00 : f32
      %50 = vector.broadcast %cst_21 : f32 to vector<32x128xf32>
      %51 = arith.select %25, %49, %50 : vector<32x128xi1>, vector<32x128xf32>
      %52 = arith.mulf %35, %51 : vector<32x128xf32>
      %c0_i32_22 = arith.constant 0 : i32
      %53 = vector.broadcast %c0_i32_22 : i32 to vector<32x128xi32>
      %54 = arith.cmpi eq, %15, %53 : vector<32x128xi32>
      %55 = arith.extui %54 : vector<32x128xi1> to vector<32x128xi32>
      %56 = arith.sitofp %55 : vector<32x128xi32> to vector<32x128xf32>
      %57 = arith.mulf %52, %56 : vector<32x128xf32>
      %58 = vector.shape_cast %57 : vector<32x128xf32> to vector<4x8x128xf32>
      %cst_23 = arith.constant dense<0.000000e+00> : vector<8x128xf32>
      %59 = vector.multi_reduction <add>, %58, %cst_23 [0] : vector<4x8x128xf32> to vector<8x128xf32>
      %60 = arith.addf %52, %56 : vector<32x128xf32>
      %61 = vector.shape_cast %60 : vector<32x128xf32> to vector<4x8x128xf32>
      %cst_24 = arith.constant dense<0.000000e+00> : vector<8x128xf32>
      %62 = vector.multi_reduction <add>, %61, %cst_24 [0] : vector<4x8x128xf32> to vector<8x128xf32>
      %63 = arith.mulf %37, %51 : vector<32x128xf32>
      %c1_i32_25 = arith.constant 1 : i32
      %64 = vector.broadcast %c1_i32_25 : i32 to vector<32x128xi32>
      %65 = arith.cmpi eq, %15, %64 : vector<32x128xi32>
      %66 = arith.extui %65 : vector<32x128xi1> to vector<32x128xi32>
      %67 = arith.sitofp %66 : vector<32x128xi32> to vector<32x128xf32>
      %68 = arith.mulf %63, %67 : vector<32x128xf32>
      %69 = vector.shape_cast %68 : vector<32x128xf32> to vector<4x8x128xf32>
      %cst_26 = arith.constant dense<0.000000e+00> : vector<8x128xf32>
      %70 = vector.multi_reduction <add>, %69, %cst_26 [0] : vector<4x8x128xf32> to vector<8x128xf32>
      %71 = arith.addf %63, %67 : vector<32x128xf32>
      %72 = vector.shape_cast %71 : vector<32x128xf32> to vector<4x8x128xf32>
      %cst_27 = arith.constant dense<0.000000e+00> : vector<8x128xf32>
      %73 = vector.multi_reduction <add>, %72, %cst_27 [0] : vector<4x8x128xf32> to vector<8x128xf32>
      %74 = arith.mulf %39, %51 : vector<32x128xf32>
      %c2_i32 = arith.constant 2 : i32
      %75 = vector.broadcast %c2_i32 : i32 to vector<32x128xi32>
      %76 = arith.cmpi eq, %15, %75 : vector<32x128xi32>
      %77 = arith.extui %76 : vector<32x128xi1> to vector<32x128xi32>
      %78 = arith.sitofp %77 : vector<32x128xi32> to vector<32x128xf32>
      %79 = arith.mulf %74, %78 : vector<32x128xf32>
      %80 = vector.shape_cast %79 : vector<32x128xf32> to vector<4x8x128xf32>
      %cst_28 = arith.constant dense<0.000000e+00> : vector<8x128xf32>
      %81 = vector.multi_reduction <add>, %80, %cst_28 [0] : vector<4x8x128xf32> to vector<8x128xf32>
      %82 = arith.addf %74, %78 : vector<32x128xf32>
      %83 = vector.shape_cast %82 : vector<32x128xf32> to vector<4x8x128xf32>
      %cst_29 = arith.constant dense<0.000000e+00> : vector<8x128xf32>
      %84 = vector.multi_reduction <add>, %83, %cst_29 [0] : vector<4x8x128xf32> to vector<8x128xf32>
      %85 = arith.mulf %41, %51 : vector<32x128xf32>
      %c3_i32 = arith.constant 3 : i32
      %86 = vector.broadcast %c3_i32 : i32 to vector<32x128xi32>
      %87 = arith.cmpi eq, %15, %86 : vector<32x128xi32>
      %88 = arith.extui %87 : vector<32x128xi1> to vector<32x128xi32>
      %89 = arith.sitofp %88 : vector<32x128xi32> to vector<32x128xf32>
      %90 = arith.mulf %85, %89 : vector<32x128xf32>
      %91 = vector.shape_cast %90 : vector<32x128xf32> to vector<4x8x128xf32>
      %cst_30 = arith.constant dense<0.000000e+00> : vector<8x128xf32>
      %92 = vector.multi_reduction <add>, %91, %cst_30 [0] : vector<4x8x128xf32> to vector<8x128xf32>
      %93 = arith.addf %85, %89 : vector<32x128xf32>
      %94 = vector.shape_cast %93 : vector<32x128xf32> to vector<4x8x128xf32>
      %cst_31 = arith.constant dense<0.000000e+00> : vector<8x128xf32>
      %95 = vector.multi_reduction <add>, %94, %cst_31 [0] : vector<4x8x128xf32> to vector<8x128xf32>
      %96 = vector.shape_cast %59 : vector<8x128xf32> to vector<1x8x128xf32>
      %97 = vector.shape_cast %70 : vector<8x128xf32> to vector<1x8x128xf32>
      %98 = vector.shape_cast %81 : vector<8x128xf32> to vector<1x8x128xf32>
      %99 = vector.shape_cast %92 : vector<8x128xf32> to vector<1x8x128xf32>
      %100 = vector.shape_cast %62 : vector<8x128xf32> to vector<1x8x128xf32>
      %101 = vector.shape_cast %73 : vector<8x128xf32> to vector<1x8x128xf32>
      %102 = vector.shape_cast %84 : vector<8x128xf32> to vector<1x8x128xf32>
      %103 = vector.shape_cast %95 : vector<8x128xf32> to vector<1x8x128xf32>
      %104 = tpu.concatenate %96, %97, %98, %99, %100, %101, %102, %103 in 0 : vector<1x8x128xf32>, vector<1x8x128xf32>, vector<1x8x128xf32>, vector<1x8x128xf32>, vector<1x8x128xf32>, vector<1x8x128xf32>, vector<1x8x128xf32>, vector<1x8x128xf32> -> vector<8x8x128xf32>
      %c0_32 = arith.constant 0 : index
      %c0_33 = arith.constant 0 : index
      %c0_34 = arith.constant 0 : index
      %c0_35 = arith.constant 0 : index
      %c0_36 = arith.constant 0 : index
      %105 = vector.load %arg5[%c0_32, %c0_33, %c0_34, %c0_35, %c0_36] : memref<1x1x8x8x128xf32, #tpu.memory_space<vmem>>, vector<1x1x8x8x128xf32>
      %106 = vector.shape_cast %105 : vector<1x1x8x8x128xf32> to vector<8x8x128xf32>
      %107 = arith.addf %106, %104 : vector<8x8x128xf32>
      %c0_37 = arith.constant 0 : index
      %c0_38 = arith.constant 0 : index
      %c0_39 = arith.constant 0 : index
      %c0_40 = arith.constant 0 : index
      %c0_41 = arith.constant 0 : index
      %108 = vector.load %arg5[%c0_37, %c0_38, %c0_39, %c0_40, %c0_41] : memref<1x1x8x8x128xf32, #tpu.memory_space<vmem>>, vector<1x1x8x8x128xf32>
      %109 = vector.shape_cast %108 : vector<1x1x8x8x128xf32> to vector<8x8x128xf32>
      %110 = vector.shape_cast %107 : vector<8x8x128xf32> to vector<1x1x8x8x128xf32>
      tpu.vector_store %arg5[%c0_37, %c0_38, %c0_39, %c0_40, %c0_41], %110 {strides = array<i32>} : memref<1x1x8x8x128xf32, #tpu.memory_space<vmem>>, vector<1x1x8x8x128xf32>,
    } else {
    }
    %true = arith.constant true
    %10 = arith.xori %7, %true : i1
    %11 = arith.extui %10 : i1 to i32
    %c0_i32_3 = arith.constant 0 : i32
    %12 = arith.cmpi ne, %11, %c0_i32_3 : i32
    scf.if %12 {
      %c0 = arith.constant 0 : index
      %c0_4 = arith.constant 0 : index
      %c0_5 = arith.constant 0 : index
      %13 = vector.load %arg4[%c0, %c0_4, %c0_5] : memref<1x32x128xi8, #tpu.memory_space<vmem>>, vector<1x32x128xi8>
      %14 = vector.shape_cast %13 : vector<1x32x128xi8> to vector<32x128xi8>
      %15 = arith.extsi %14 : vector<32x128xi8> to vector<32x128xi32>
      %c0_6 = arith.constant 0 : index
      %c0_7 = arith.constant 0 : index
      %c0_8 = arith.constant 0 : index
      %c0_9 = arith.constant 0 : index
      %16 = vector.load %arg3[%c0_6, %c0_7, %c0_8, %c0_9] : memref<1x4x32x128xf32, #tpu.memory_space<vmem>>, vector<1x1x32x128xf32>
      %17 = vector.shape_cast %16 : vector<1x1x32x128xf32> to vector<32x128xf32>
      %c0_10 = arith.constant 0 : index
      %c1 = arith.constant 1 : index
      %c0_11 = arith.constant 0 : index
      %c0_12 = arith.constant 0 : index
      %18 = vector.load %arg3[%c0_10, %c1, %c0_11, %c0_12] : memref<1x4x32x128xf32, #tpu.memory_space<vmem>>, vector<1x1x32x128xf32>
      %19 = vector.shape_cast %18 : vector<1x1x32x128xf32> to vector<32x128xf32>
      %c0_13 = arith.constant 0 : index
      %c2 = arith.constant 2 : index
      %c0_14 = arith.constant 0 : index
      %c0_15 = arith.constant 0 : index
      %20 = vector.load %arg3[%c0_13, %c2, %c0_14, %c0_15] : memref<1x4x32x128xf32, #tpu.memory_space<vmem>>, vector<1x1x32x128xf32>
      %21 = vector.shape_cast %20 : vector<1x1x32x128xf32> to vector<32x128xf32>
      %c0_16 = arith.constant 0 : index
      %c3 = arith.constant 3 : index
      %c0_17 = arith.constant 0 : index
      %c0_18 = arith.constant 0 : index
      %22 = vector.load %arg3[%c0_16, %c3, %c0_17, %c0_18] : memref<1x4x32x128xf32, #tpu.memory_space<vmem>>, vector<1x1x32x128xf32>
      %23 = vector.shape_cast %22 : vector<1x1x32x128xf32> to vector<32x128xf32>
      %24 = arith.maximumf %17, %19 : vector<32x128xf32>
      %25 = arith.maximumf %24, %21 : vector<32x128xf32>
      %26 = arith.maximumf %25, %23 : vector<32x128xf32>
      %27 = arith.subf %17, %26 : vector<32x128xf32>
      %28 = math.exp %27 : vector<32x128xf32>
      %29 = arith.subf %19, %26 : vector<32x128xf32>
      %30 = math.exp %29 : vector<32x128xf32>
      %31 = arith.subf %21, %26 : vector<32x128xf32>
      %32 = math.exp %31 : vector<32x128xf32>
      %33 = arith.subf %23, %26 : vector<32x128xf32>
      %34 = math.exp %33 : vector<32x128xf32>
      %35 = arith.addf %28, %30 : vector<32x128xf32>
      %36 = arith.addf %35, %32 : vector<32x128xf32>
      %37 = arith.addf %36, %34 : vector<32x128xf32>
      %38 = tpu.reciprocal %37 {approx = true} : vector<32x128xf32> -> vector<32x128xf32>
      %39 = arith.mulf %37, %38 : vector<32x128xf32>
      %cst = arith.constant 2.000000e+00 : f32
      %40 = vector.broadcast %cst : f32 to vector<32x128xf32>
      %41 = arith.subf %40, %39 : vector<32x128xf32>
      %42 = arith.mulf %38, %41 : vector<32x128xf32>
      %43 = arith.mulf %28, %42 : vector<32x128xf32>
      %c0_i32_19 = arith.constant 0 : i32
      %44 = vector.broadcast %c0_i32_19 : i32 to vector<32x128xi32>
      %45 = arith.cmpi eq, %15, %44 : vector<32x128xi32>
      %46 = arith.extui %45 : vector<32x128xi1> to vector<32x128xi32>
      %47 = arith.sitofp %46 : vector<32x128xi32> to vector<32x128xf32>
      %48 = arith.mulf %43, %47 : vector<32x128xf32>
      %49 = vector.shape_cast %48 : vector<32x128xf32> to vector<4x8x128xf32>
      %cst_20 = arith.constant dense<0.000000e+00> : vector<8x128xf32>
      %50 = vector.multi_reduction <add>, %49, %cst_20 [0] : vector<4x8x128xf32> to vector<8x128xf32>
      %51 = arith.addf %43, %47 : vector<32x128xf32>
      %52 = vector.shape_cast %51 : vector<32x128xf32> to vector<4x8x128xf32>
      %cst_21 = arith.constant dense<0.000000e+00> : vector<8x128xf32>
      %53 = vector.multi_reduction <add>, %52, %cst_21 [0] : vector<4x8x128xf32> to vector<8x128xf32>
      %54 = arith.mulf %30, %42 : vector<32x128xf32>
      %c1_i32_22 = arith.constant 1 : i32
      %55 = vector.broadcast %c1_i32_22 : i32 to vector<32x128xi32>
      %56 = arith.cmpi eq, %15, %55 : vector<32x128xi32>
      %57 = arith.extui %56 : vector<32x128xi1> to vector<32x128xi32>
      %58 = arith.sitofp %57 : vector<32x128xi32> to vector<32x128xf32>
      %59 = arith.mulf %54, %58 : vector<32x128xf32>
      %60 = vector.shape_cast %59 : vector<32x128xf32> to vector<4x8x128xf32>
      %cst_23 = arith.constant dense<0.000000e+00> : vector<8x128xf32>
      %61 = vector.multi_reduction <add>, %60, %cst_23 [0] : vector<4x8x128xf32> to vector<8x128xf32>
      %62 = arith.addf %54, %58 : vector<32x128xf32>
      %63 = vector.shape_cast %62 : vector<32x128xf32> to vector<4x8x128xf32>
      %cst_24 = arith.constant dense<0.000000e+00> : vector<8x128xf32>
      %64 = vector.multi_reduction <add>, %63, %cst_24 [0] : vector<4x8x128xf32> to vector<8x128xf32>
      %65 = arith.mulf %32, %42 : vector<32x128xf32>
      %c2_i32 = arith.constant 2 : i32
      %66 = vector.broadcast %c2_i32 : i32 to vector<32x128xi32>
      %67 = arith.cmpi eq, %15, %66 : vector<32x128xi32>
      %68 = arith.extui %67 : vector<32x128xi1> to vector<32x128xi32>
      %69 = arith.sitofp %68 : vector<32x128xi32> to vector<32x128xf32>
      %70 = arith.mulf %65, %69 : vector<32x128xf32>
      %71 = vector.shape_cast %70 : vector<32x128xf32> to vector<4x8x128xf32>
      %cst_25 = arith.constant dense<0.000000e+00> : vector<8x128xf32>
      %72 = vector.multi_reduction <add>, %71, %cst_25 [0] : vector<4x8x128xf32> to vector<8x128xf32>
      %73 = arith.addf %65, %69 : vector<32x128xf32>
      %74 = vector.shape_cast %73 : vector<32x128xf32> to vector<4x8x128xf32>
      %cst_26 = arith.constant dense<0.000000e+00> : vector<8x128xf32>
      %75 = vector.multi_reduction <add>, %74, %cst_26 [0] : vector<4x8x128xf32> to vector<8x128xf32>
      %76 = arith.mulf %34, %42 : vector<32x128xf32>
      %c3_i32 = arith.constant 3 : i32
      %77 = vector.broadcast %c3_i32 : i32 to vector<32x128xi32>
      %78 = arith.cmpi eq, %15, %77 : vector<32x128xi32>
      %79 = arith.extui %78 : vector<32x128xi1> to vector<32x128xi32>
      %80 = arith.sitofp %79 : vector<32x128xi32> to vector<32x128xf32>
      %81 = arith.mulf %76, %80 : vector<32x128xf32>
      %82 = vector.shape_cast %81 : vector<32x128xf32> to vector<4x8x128xf32>
      %cst_27 = arith.constant dense<0.000000e+00> : vector<8x128xf32>
      %83 = vector.multi_reduction <add>, %82, %cst_27 [0] : vector<4x8x128xf32> to vector<8x128xf32>
      %84 = arith.addf %76, %80 : vector<32x128xf32>
      %85 = vector.shape_cast %84 : vector<32x128xf32> to vector<4x8x128xf32>
      %cst_28 = arith.constant dense<0.000000e+00> : vector<8x128xf32>
      %86 = vector.multi_reduction <add>, %85, %cst_28 [0] : vector<4x8x128xf32> to vector<8x128xf32>
      %87 = vector.shape_cast %50 : vector<8x128xf32> to vector<1x8x128xf32>
      %88 = vector.shape_cast %61 : vector<8x128xf32> to vector<1x8x128xf32>
      %89 = vector.shape_cast %72 : vector<8x128xf32> to vector<1x8x128xf32>
      %90 = vector.shape_cast %83 : vector<8x128xf32> to vector<1x8x128xf32>
      %91 = vector.shape_cast %53 : vector<8x128xf32> to vector<1x8x128xf32>
      %92 = vector.shape_cast %64 : vector<8x128xf32> to vector<1x8x128xf32>
      %93 = vector.shape_cast %75 : vector<8x128xf32> to vector<1x8x128xf32>
      %94 = vector.shape_cast %86 : vector<8x128xf32> to vector<1x8x128xf32>
      %95 = tpu.concatenate %87, %88, %89, %90, %91, %92, %93, %94 in 0 : vector<1x8x128xf32>, vector<1x8x128xf32>, vector<1x8x128xf32>, vector<1x8x128xf32>, vector<1x8x128xf32>, vector<1x8x128xf32>, vector<1x8x128xf32>, vector<1x8x128xf32> -> vector<8x8x128xf32>
      %c0_29 = arith.constant 0 : index
      %c0_30 = arith.constant 0 : index
      %c0_31 = arith.constant 0 : index
      %c0_32 = arith.constant 0 : index
      %c0_33 = arith.constant 0 : index
      %96 = vector.load %arg5[%c0_29, %c0_30, %c0_31, %c0_32, %c0_33] : memref<1x1x8x8x128xf32, #tpu.memory_space<vmem>>, vector<1x1x8x8x128xf32>
      %97 = vector.shape_cast %96 : vector<1x1x8x8x128xf32> to vector<8x8x128xf32>
      %98 = arith.addf %97, %95 : vector<8x8x128xf32>
      %c0_34 = arith.constant 0 : index
      %c0_35 = arith.constant 0 : index
      %c0_36 = arith.constant 0 : index
      %c0_37 = arith.constant 0 : index
      %c0_38 = arith.constant 0 : index
      %99 = vector.load %arg5[%c0_34, %c0_35, %c0_36, %c0_37, %c0_38] : memref<1x1x8x8x128xf32, #tpu.memory_space<vmem>>, vector<1x1x8x8x128xf32>
      %100 = vector.shape_cast %99 : vector<1x1x8x8x128xf32> to vector<8x8x128xf32>
      %101 = vector.shape_cast %98 : vector<8x8x128xf32> to vector<1x1x8x8x128xf32>
      tpu.vector_store %arg5[%c0_34, %c0_35, %c0_36, %c0_37, %c0_38], %101 {strides = array<i32>} : memref<1x1x8x8x128xf32, #tpu.memory_space<vmem>>, vector<1x1x8x8x128xf32>,
    } else {
    }
    return
  }
  func.func @transform_0(%arg0: i32, %arg1: i32, %arg2: i32) -> (i32, i32, i32, i32) {
    %c1_i32 = arith.constant 1 : i32
    %0 = arith.muli %arg1, %c1_i32 : i32
    %1 = arith.addi %0, %arg2 : i32
    %c0_i32 = arith.constant 0 : i32
    %2 = arith.minsi %1, %c0_i32 : i32
    %c0_i32_0 = arith.constant 0 : i32
    %c0_i32_1 = arith.constant 0 : i32
    %c0_i32_2 = arith.constant 0 : i32
    return %arg0, %c0_i32_0, %2, %c0_i32_1 : i32, i32, i32, i32
  }
  func.func @transform_1(%arg0: i32, %arg1: i32, %arg2: i32) -> (i32, i32, i32) {
    %c1_i32 = arith.constant 1 : i32
    %0 = arith.muli %arg1, %c1_i32 : i32
    %1 = arith.addi %0, %arg2 : i32
    %c0_i32 = arith.constant 0 : i32
    %c0_i32_0 = arith.constant 0 : i32
    return %arg0, %1, %c0_i32 : i32, i32, i32
  }
  func.func @transform_2(%arg0: i32, %arg1: i32, %arg2: i32) -> (i32, i32, i32, i32, i32) {
    %c0_i32 = arith.constant 0 : i32
    %c0_i32_0 = arith.constant 0 : i32
    %c0_i32_1 = arith.constant 0 : i32
    %c0_i32_2 = arith.constant 0 : i32
    return %arg0, %arg1, %c0_i32, %c0_i32_0, %c0_i32_1 : i32, i32, i32, i32, i32
  }
}

</mosaic_0001>

<bundles_post_ra>
// kernel: tpu_custom_call.1
= control target key start
LH: loop header
LB: loop body
LE: loop exit
PB: predicated region body
PF: predicated region fallthrough
CT: control target
= control target key end

     0   :  { %7 = vsyncpa [#allocation3], 0  ;;  %s1687_s0 = inlined_call_operand.hbm [shape: f32[2,4,2,128], index: 0, kind: input, shape index: {}]   ;;  %s1688_s1 = inlined_call_operand.hbm [shape: s8[2,32,128], index: 1, kind: input, shape index: {}]   ;;  %s1689_s2 = inlined_call_operand.hbm [shape: f32[2,1,8,8,128], index: 2, kind: output, shape index: {}]  }
   0x1   :  { %9 = vsyncpa [#allocation3 + $0x1], 0 }
   0x2   :  { %10 = vsyncpa [#allocation6], 0 }
   0x3   :  { %12 = vsyncpa [#allocation6 + $0x1], 0 }
   0x4   :  { %13 = vsyncpa [#allocation4], 0 }
   0x5   :  { %15 = vsyncpa [#allocation4 + $0x1], 0  ;;  %s1291_s9 = smov 0   ;;  %s1293_s10 = smov 0  }
   0x6   :  { %s1295_s11 = smov 0   ;;  %s1297_s12 = smov 0  }
   0x7   :  { %s1299_s13 = smov 0   ;;  %s1301_s14 = smov 0  }
   0x8 LB: > { %s966_s15 = sadd.s32 4294967295, %s1264_s14   ;;  %s967_s16 = sadd.s32 4294967294, %s1264_s14   ;;  %s1264_s14 = sphi %s1301_s14, %s21_s14   ;;  %s1260_s13 = sphi %s1299_s13, %s1705_s13   ;;  %s1256_s12 = sphi %s1297_s12, %s1704_s12   ;;  %s1252_s11 = sphi %s1295_s11, %s1703_s11   ;;  %s1248_s10 = sphi %s1293_s10, %s1702_s10   ;;  %s1244_s9 = sphi %s1291_s9, %s1701_s9  }
   0x9   : > { %s40_s17 = sadd.s32 1, %s1260_s13  ;;  %s55_s18 = sadd.s32 1, %s1252_s11 }
   0xa   : > { %p42_p0 = scmp.ge.s32.totalorder %s40_s17, 2  ;;  %p62_p1 = scmp.ne.s32.totalorder %s1252_s11, %s1248_s10 }
   0xb   : > { %p63_p2 = scmp.eq.s32.totalorder %s1264_s14, 0  ;;  %p68_p3 = scmp.ne.s32.totalorder %s1248_s10, %s1244_s9 }
   0xc   : > { %s1707_s17 = smov (%p42_p0, %s40_s17), 0  ;;  %p69_p5 = scmp.eq.s32.totalorder %s966_s15, 0 }
   0xd   : > { %p1332_p4 = por %p63_p2, %p62_p1  ;;  %s50_s20 = ssub.s32 %s1260_s13, %s1707_s17 }
   0xe   : > { %p124_p6 = scmp.eq.s32.totalorder %s966_s15, 1  ;;  %p53_p7 = scmp.eq.s32.totalorder %s50_s20, 0 }
   0xf   : > { %p1338_p8 = por %p69_p5, %p68_p3  ;;  %p130_p10 = scmp.eq.s32.totalorder %s967_s16, 1 }
  0x10   : > { %p1342_p9 = por %p124_p6, %p62_p1  ;;  %p1690_p12 = scmp.ge.s32.totalorder %s1264_s14, 2 }
  0x11   : > { %s1694_s21 = scalar_select %p1338_p8, 1, 0 }
  0x12   : > { %s1695_s22 = scalar_select %p1342_p9, 1, 0 }
  0x13   : > { %s1347_s23 = scalar_select %p53_p7, %s1252_s11, %s55_s18  }
  0x14   : > { %p1349_p11 = por %p130_p10, %p68_p3  ;;  %146 = sbr.rel (%p1690_p12) target bundleno = 72 (0x48), region = 16 }
  0x16   : > { %s1696_s24 = scalar_select %p1349_p11, 1, 0 }
  0x1b   : > { %149 = sbr.rel (!%p1332_p4) target bundleno = 47 (0x2f), region = 20 }
  0x22   : > { %s150_s25 = sand.u32 1, %s1252_s11  }
  0x23   : > { %s970_s26 = sshll.u32 %s150_s25, 7  ;;  %s151_s27 = scalar_lea.sflag [#allocation3], %s150_s25 }
  0x24   : > { %s154_s28 = scalar_lea.vmem [#allocation2], %s970_s26 }
  0x25   : > { %163 = vsyncadd %s151_s27, 1920  ;;  %s1042_s29 = sshll.u32 %s1260_s13, 7  ;;  %s175_s30 = sld [smem:[#allocation0]]  }
  0x26   : > { %s168_s5 = scalar_lea.hbm %s1687_s0, %s1042_s29  ;;  %s183_s6 = sshll.u32 %s154_s28, 4  ;;  %s184_s6 = int_to_ptr.vmem [resolvable:$true] %s183_s6 }
  0x27   : > { %s1266_s7 = smov 32   ;;  %s1267_s8 = smov 512  }
  0x28   : > { %190 = sst [smem:[#allocation9]] %s1266_s7  ;;  %s1268_s15 = smov 1  }
  0x29   : > { %192 = sst [smem:[#allocation9 + $0x1]] %s1267_s8  ;;  %s1269_s20 = smov 2  }
  0x2a   : > { %194 = sst [smem:[#allocation9 + $0x2]] %s1268_s15  ;;  %s1270_s25 = smov [#allocation8]  }
  0x2b   : > { %s973_s16 = sshll.u32 %s175_s30, 26  ;;  %196 = sst [smem:[#allocation9 + $0x3]] %s1266_s7 }
  0x2c   : > { %s974_s18 = sadd.s32 134217728, %s973_s16  ;;  %198 = sst [smem:[#allocation9 + $0x4]] %s1266_s7 }
  0x2d   : > { %200 = sst [smem:[#allocation9 + $0x5]] %s1269_s20 }
  0x2e   : > { %202 = dma.general %s168_s5, 128, %s184_s6, %s151_s27, %s1270_s25, [#allocation9], %s974_s18, 0  }
  0x2f PF: > { %s206_s26 = sand.u32 1, %s1252_s11   ;;  %s976_s28 = sshll.u32 %s1260_s13, 7 }
  0x30   : > { %s975_s29 = sshll.u32 %s206_s26, 3  ;;  %s1368_s8 = scalar_lea.hbm %s1688_s1, %s976_s28 }
  0x31   : > { %s210_s30 = scalar_lea.vmem [#allocation5], %s975_s29  ;;  %s207_s27 = scalar_lea.sflag [#allocation6], %s206_s26 }
  0x32   : > { %s219_s7 = sshll.u32 %s210_s30, 4  ;;  %s1150_s5 = scalar_lea.hbm %s1368_s8, 128  ;;  %s220_s7 = int_to_ptr.vmem [resolvable:$true] %s219_s7 }
  0x33   : > { %p1151_p13 = scmp.ne.s32.totalorder %s1368_s8, %s1150_s5  ;;  %s1154_s16 = scalar_lea.hbm %s1688_s1, 256 }
  0x34   : > { %p1155_p2 = scmp.lt.u32.totalorder %s1368_s8, %s1688_s1  ;;  %p1156_p3 = scmp.lt.u32.totalorder %s1154_s16, %s1150_s5 }
  0x35   : > { %p1152_p0 = pnand %p1151_p13, %p1332_p4  ;;  %p1158_p6 = scmp.lt.u32.totalorder %s1150_s5, %s1368_s8 }
  0x36   : > { %p1157_p5 = por %p1156_p3, %p1155_p2 }
  0x37   : > { %p1153_p1 = pneg %p1152_p0 }
  0x38   : > { %p1159_p7 = por %p1158_p6, %p1157_p5 }
  0x3a   : > { %p1160_p10 = pnand %p1159_p7, %p1153_p1 }
  0x3c   : > { %1163 = shalt.err (!%p1160_p10)
}
  0x3d   : > { %s1164_s25 = scalar_lea.vmem %s220_s7, 128  ;;  %s1271_s26 = smov [#allocation5]  }
  0x3e   : > { %p1165_p12 = scmp.ne.s32.totalorder %s220_s7, %s1164_s25  ;;  %s1168_s28 = sshll.u32 %s1271_s26, 4  ;;  %s1169_s28 = int_to_ptr.vmem [resolvable:$false] %s1168_s28 }
  0x3f   : > { %s1170_s29 = scalar_lea.vmem %s1169_s28, 256  ;;  %p1171_p11 = scmp.lt.s32.totalorder %s220_s7, %s1169_s28 }
  0x40   : > { %p1166_p13 = pnand %p1165_p12, %p1332_p4  ;;  %p1172_p9 = scmp.lt.s32.totalorder %s1170_s29, %s1164_s25 }
  0x42   : > { %p1167_p0 = pneg %p1166_p13  ;;  %p1173_p8 = por %p1172_p9, %p1171_p11 }
  0x44   : > { %p1174_p2 = pnand %p1173_p8, %p1167_p0 }
  0x46   : > { %1177 = shalt.err (!%p1174_p2)
}
  0x47   : > { %1044 = dma.hbm_to_vmem [thread:$0]  (%p1332_p4), %s1368_s8, 128, %s220_s7, %s207_s27  }
  0x48 PF: > { %p977_p1 = scmp.ge.s32.totalorder %s1264_s14, 1  ;;  %p224_p3 = scmp.lt.s32.totalorder %s1264_s14, 3 }
  0x4a   : > { %p225_p12 = pnand %p977_p1, %p224_p3 }
  0x4b   : > { %s1390_s3 = sand.u32 (!%p225_p12), 1, %s1248_s10   ;;  %p1697_p8 = scmp.ne.s32.totalorder (!%p225_p12), %s1694_s21, 0 }
  0x4c   : > { %228 = sbr.rel (%p225_p12) target bundleno = 186 (0xba), region = 28  ;;  %s978_s4 = sshll.u32 (!%p225_p12), %s1390_s3, 7 }
  0x4d   : > { %s231_s30 = scalar_lea.sflag (!%p225_p12), [#allocation3], %s1390_s3  ;;  %s1394_s5 = scalar_lea.vmem (!%p225_p12), [#allocation2], %s978_s4 }
  0x53   : > { %1231 = dma.done.wait (%p1697_p8), %s231_s30, 2048  }
  0x54   : > { %1233 = vsyncadd (%p1697_p8), %s231_s30, 4294965248  ;;  %s979_s19 = sshll.u32 %s1390_s3, 3  ;;  %s240_s8 = scalar_lea.sflag [#allocation6], %s1390_s3 }
  0x55   : > { %s243_s7 = scalar_lea.vmem [#allocation5], %s979_s19 }
  0x56   : > { %1235 = dma.done.wait (%p1697_p8), %s240_s8, 128  }
  0x57   : > { %1237 = vsyncadd (%p1697_p8), %s240_s8, 4294967168  ;;  %v295_v0 = vld [vmem:[%s243_s7] sm:$0xff]  ;;  %v302_v7 = vld [vmem:[%s1394_s5 + $0x10] sm:$0xff]  ;;  %s980_s21 = sshll.u32 %s1390_s3, 6  ;;  %s1043_s6 = sshll.u32 %s1256_s12, 10 }
  0x58   : > { %v1406_v1 = vunpack.c.0.s8 %v295_v0  ;;  %v1408_v2 = vunpack.c.1.s8 %v295_v0  ;;  %v1410_v3 = vunpack.c.2.s8 %v295_v0  ;;  %v1412_v4 = vunpack.c.3.s8 %v295_v0  ;;  %v300_v5 = vld [vmem:[%s1394_s5] sm:$0xff]  ;;  %v301_v6 = vld [vmem:[%s1394_s5 + $0x8] sm:$0xff]  ;;  %v303_v10 = vld [vmem:[%s1394_s5 + $0x18] sm:$0xff]  ;;  %s1609_s27 = scalar_lea.vmem [#allocation7], %s980_s21  ;;  %s1634_s20 = scalar_lea.hbm %s1689_s2, %s1043_s6 }
  0x59   : > { %v981_v8 = vld [vmem:[%s1394_s5 + $0x20] sm:$0xff]  ;;  %v982_v9 = vld [vmem:[%s1394_s5 + $0x28] sm:$0xff]  ;;  %v983_v11 = vld [vmem:[%s1394_s5 + $0x30] sm:$0xff]  ;;  %s851_s15 = sshll.u32 %s1609_s27, 4  ;;  %s836_s25 = scalar_lea.sflag [#allocation4], %s1390_s3  ;;  %s1636_s15 = int_to_ptr.vmem [resolvable:$true] %s851_s15 }
  0x5a   : > { %v984_v12 = vld [vmem:[%s1394_s5 + $0x38] sm:$0xff]  ;;  %vm319_vm0 = vcmp.ge.s32.totalorder %v1406_v1, 0  ;;  %vm320_vm1 = vcmp.ge.s32.totalorder %v1408_v2, 0  ;;  %vm321_vm2 = vcmp.ge.s32.totalorder %v1410_v3, 0  ;;  %v985_v13 = vld [vmem:[%s1394_s5 + $0x40] sm:$0xff]  ;;  %v986_v14 = vld [vmem:[%s1394_s5 + $0x48] sm:$0xff] }
  0x5b   : > { %vm322_vm3 = vcmp.ge.s32.totalorder %v1412_v4, 0  ;;  %v987_v15 = vld [vmem:[%s1394_s5 + $0x50] sm:$0xff]  ;;  %v988_v16 = vld [vmem:[%s1394_s5 + $0x58] sm:$0xff]  ;;  %v323_v17 = vsel %vm319_vm0, %v300_v5, 0.0  ;;  %v324_v18 = vsel %vm320_vm1, %v301_v6, 0.0  ;;  %v327_v19 = vsel %vm319_vm0, %v981_v8, 0.0 }
  0x5c   : > { %v328_v20 = vsel %vm320_vm1, %v982_v9, 0.0  ;;  %v989_v21 = vld [vmem:[%s1394_s5 + $0x60] sm:$0xff]  ;;  %v990_v22 = vld [vmem:[%s1394_s5 + $0x68] sm:$0xff]  ;;  %v325_v23 = vsel %vm321_vm2, %v302_v7, 0.0  ;;  %v326_v24 = vsel %vm322_vm3, %v303_v10, 0.0  ;;  %v329_v25 = vsel %vm321_vm2, %v983_v11, 0.0 }
  0x5d   : > { %v330_v26 = vsel %vm322_vm3, %v984_v12, 0.0  ;;  %v991_v27 = vld [vmem:[%s1394_s5 + $0x70] sm:$0xff]  ;;  %v992_v28 = vld [vmem:[%s1394_s5 + $0x78] sm:$0xff]  ;;  %v331_v29 = vsel %vm319_vm0, %v985_v13, 0.0  ;;  %v332_v30 = vsel %vm320_vm1, %v986_v14, 0.0  ;;  %v333_v31 = vsel %vm321_vm2, %v987_v15, 0.0 }
  0x5e   : > { %v334_v32 = vsel %vm322_vm3, %v988_v16, 0.0  ;;  %v339_v33 = vmax.f32 %v323_v17, %v327_v19  ;;  %v340_v34 = vmax.f32 %v324_v18, %v328_v20  ;;  %v335_v35 = vsel %vm319_vm0, %v989_v21, 0.0  ;;  %s1178_s26 = scalar_lea.vmem %s1636_s15, 1024  ;;  %p1698_p9 = scmp.ne.s32.totalorder %s1695_s22, 0 }
  0x5f   : > { %v336_v36 = vsel %vm320_vm1, %v990_v22, 0.0  ;;  %v341_v37 = vmax.f32 %v325_v23, %v329_v25  ;;  %v342_v38 = vmax.f32 %v326_v24, %v330_v26  ;;  %v337_v39 = vsel %vm321_vm2, %v991_v27, 0.0  ;;  %p1179_p4 = scmp.ne.s32.totalorder %s1636_s15, %s1178_s26  ;;  %s1273_s12 = smov [#allocation7]  }
  0x60   : > { %v338_v40 = vsel %vm322_vm3, %v992_v28, 0.0  ;;  %v343_v41 = vmax.f32 %v339_v33, %v331_v29  ;;  %v344_v42 = vmax.f32 %v340_v34, %v332_v30  ;;  %vm435_vm4 = vcmp.eq.s32.totalorder %v1406_v1, 0  ;;  %s1182_s28 = sshll.u32 %s1273_s12, 4  ;;  %s1183_s28 = int_to_ptr.vmem [resolvable:$false] %s1182_s28 }
  0x61   : > { %v345_v43 = vmax.f32 %v341_v37, %v333_v31  ;;  %v346_v44 = vmax.f32 %v342_v38, %v334_v32  ;;  %vm436_vm5 = vcmp.eq.s32.totalorder %v1408_v2, 0  ;;  %vm437_vm6 = vcmp.eq.s32.totalorder %v1410_v3, 0  ;;  %p1180_p11 = pnand %p1179_p4, %p1698_p9  ;;  %s1184_s29 = scalar_lea.vmem %s1183_s28, 2048 }
  0x62   : > { %v347_v45 = vmax.f32 %v343_v41, %v335_v35  ;;  %v348_v46 = vmax.f32 %v344_v42, %v336_v36  ;;  %vm438_vm7 = vcmp.eq.s32.totalorder %v1412_v4, 0  ;;  %vm465_vm8 = vcmp.eq.s32.totalorder %v1406_v1, 1  ;;  %p1185_p6 = scmp.lt.s32.totalorder %s1636_s15, %s1183_s28  ;;  %p1186_p7 = scmp.lt.s32.totalorder %s1184_s29, %s1178_s26 }
  0x63   : > { %v349_v47 = vmax.f32 %v345_v43, %v337_v39  ;;  %v350_v48 = vmax.f32 %v346_v44, %v338_v40  ;;  %vm466_vm9 = vcmp.eq.s32.totalorder %v1408_v2, 1  ;;  %vm467_vm10 = vcmp.eq.s32.totalorder %v1410_v3, 1  ;;  %p1181_p5 = pneg %p1180_p11 }
  0x64   : > { %v351_v49 = vsub.f32 %v323_v17, %v347_v45  ;;  %v352_v50 = vsub.f32 %v324_v18, %v348_v46  ;;  %v363_v51 = vsub.f32 %v327_v19, %v347_v45  ;;  %v364_v54 = vsub.f32 %v328_v20, %v348_v46  ;;  %p1187_p10 = por %p1186_p7, %p1185_p6 }
  0x65   : > { %v353_v52 = vsub.f32 %v325_v23, %v349_v47  ;;  %v354_v53 = vsub.f32 %v326_v24, %v350_v48  ;;  %v365_v57 = vsub.f32 %v329_v25, %v349_v47  ;;  %v366_v60 = vsub.f32 %v330_v26, %v350_v48 }
  0x66   : > { %v355_v55 = vmul.f32 1.442695, %v351_v49  ;;  %v357_v56 = vmul.f32 1.442695, %v352_v50  ;;  %v367_v61 = vmul.f32 1.442695, %v363_v51  ;;  %v375_v62 = vsub.f32 %v331_v29, %v347_v45  ;;  %p1188_p13 = pnand %p1187_p10, %p1181_p5 }
  0x67   : > { %v359_v58 = vmul.f32 1.442695, %v353_v52  ;;  %v361_v59 = vmul.f32 1.442695, %v354_v53  ;;  %v369_v63 = vmul.f32 1.442695, %v364_v54  ;;  %v376_v0 = vsub.f32 %v332_v30, %v348_v46 }
  0x68   : > { %1110 = vpow2.f32 %v355_v55  ;;  %v371_v5 = vmul.f32 1.442695, %v365_v57  ;;  %v377_v6 = vsub.f32 %v333_v31, %v349_v47  ;;  %v373_v7 = vmul.f32 1.442695, %v366_v60 }
  0x69   : > { %1112 = vpow2.f32 %v357_v56  ;;  %v378_v8 = vsub.f32 %v334_v32, %v350_v48  ;;  %v379_v9 = vmul.f32 1.442695, %v375_v62  ;;  %v387_v10 = vsub.f32 %v335_v35, %v347_v45 }
  0x6a   : > { %1114 = vpow2.f32 %v359_v58  ;;  %v381_v11 = vmul.f32 1.442695, %v376_v0  ;;  %v388_v12 = vsub.f32 %v336_v36, %v348_v46  ;;  %v383_v13 = vmul.f32 1.442695, %v377_v6 }
  0x6b   : > { %1116 = vpow2.f32 %v361_v59  ;;  %v389_v14 = vsub.f32 %v337_v39, %v349_v47  ;;  %v385_v15 = vmul.f32 1.442695, %v378_v8  ;;  %v390_v16 = vsub.f32 %v338_v40, %v350_v48 }
  0x6c   : > { %1118 = vpow2.f32 %v367_v61  ;;  %v391_v17 = vmul.f32 1.442695, %v387_v10  ;;  %v393_v18 = vmul.f32 1.442695, %v388_v12  ;;  %vm468_vm11 = vcmp.eq.s32.totalorder %v1412_v4, 1 }
  0x6d   : > { %1120 = vpow2.f32 %v369_v63  ;;  %v395_v20 = vmul.f32 1.442695, %v389_v14  ;;  %v397_v22 = vmul.f32 1.442695, %v390_v16  ;;  %v1272_v49 = vmov 0.0  }
  0x6e   : > { %1122 = vpow2.f32 %v371_v5  ;;  %v1522_v50 = vsel %vm435_vm4, 1.0, %v1272_v49  ;;  %v1524_v51 = vsel %vm436_vm5, 1.0, %v1272_v49  ;;  %vm495_vm12 = vcmp.eq.s32.totalorder %v1406_v1, 2 }
  0x6f   : > { %1124 = vpow2.f32 %v373_v7  ;;  %vm496_vm13 = vcmp.eq.s32.totalorder %v1408_v2, 2  ;;  %v1528_v53 = vsel %vm437_vm6, 1.0, %v1272_v49  ;;  %v1530_v54 = vsel %vm438_vm7, 1.0, %v1272_v49 }
  0x70   : > { %1126 = vpow2.f32 %v379_v9  ;;  %v1532_v55 = vsel %vm465_vm8, 1.0, %v1272_v49  ;;  %v1534_v56 = vsel %vm466_vm9, 1.0, %v1272_v49  ;;  %v1536_v59 = vsel %vm467_vm10, 1.0, %v1272_v49 }
  0x71   : > { %1128 = vpow2.f32 %v381_v11  ;;  %v1538_v60 = vsel %vm468_vm11, 1.0, %v1272_v49  ;;  %vm497_vm14 = vcmp.eq.s32.totalorder %v1410_v3, 2  ;;  %vm498_vm15 = vcmp.eq.s32.totalorder %v1412_v4, 2 }
  0x72   : > { %v1466_v19 = vpop.eup %1110  ;;  %1130 = vpow2.f32 %v383_v13  ;;  %v1542_v63 = vsel %vm495_vm12, 1.0, %v1272_v49  ;;  %v1544_v0 = vsel %vm496_vm13, 1.0, %v1272_v49  ;;  %vm525_vm4 = vcmp.eq.s32.totalorder %v1406_v1, 3 }
  0x73   : > { %v1468_v21 = vpop.eup %1112  ;;  %1132 = vpow2.f32 %v385_v15  ;;  %vm526_vm5 = vcmp.eq.s32.totalorder %v1408_v2, 3  ;;  %vm527_vm6 = vcmp.eq.s32.totalorder %v1410_v3, 3  ;;  %vm528_vm7 = vcmp.eq.s32.totalorder %v1412_v4, 3 }
  0x74   : > { %v1470_v23 = vpop.eup %1114  ;;  %1134 = vpow2.f32 %v391_v17  ;;  %v1552_v12 = vsel %vm497_vm14, 1.0, %v1272_v49  ;;  %v1554_v13 = vsel %vm498_vm15, 1.0, %v1272_v49  ;;  %v1556_v16 = vsel %vm525_vm4, 1.0, %v1272_v49 }
  0x75   : > { %v1472_v24 = vpop.eup %1116  ;;  %1136 = vpow2.f32 %v393_v18  ;;  %v1558_v17 = vsel %vm526_vm5, 1.0, %v1272_v49 }
  0x76   : > { %v1474_v25 = vpop.eup %1118  ;;  %1138 = vpow2.f32 %v395_v20 }
  0x77   : > { %v1476_v26 = vpop.eup %1120  ;;  %1140 = vpow2.f32 %v397_v22  ;;  %v399_v27 = vadd.f32 %v1474_v25, %v1466_v19  ;;  %v1562_v22 = vsel %vm527_vm6, 1.0, %v1272_v49 }
  0x78   : > { %v1480_v28 = vpop.eup %1122  ;;  %v400_v29 = vadd.f32 %v1476_v26, %v1468_v21 }
  0x79   : > { %v1484_v30 = vpop.eup %1124  ;;  %v401_v31 = vadd.f32 %v1480_v28, %v1470_v23 }
  0x7a   : > { %v1488_v32 = vpop.eup %1126  ;;  %v402_v33 = vadd.f32 %v1484_v30, %v1472_v24 }
  0x7b   : > { %v1492_v34 = vpop.eup %1128  ;;  %v403_v35 = vadd.f32 %v1488_v32, %v399_v27  ;;  %v1564_v27 = vsel %vm528_vm7, 1.0, %v1272_v49 }
  0x7c   : > { %v1495_v36 = vpop.eup %1130  ;;  %v404_v37 = vadd.f32 %v1492_v34, %v400_v29 }
  0x7d   : > { %v1498_v38 = vpop.eup %1132  ;;  %v405_v39 = vadd.f32 %v1495_v36, %v401_v31 }
  0x7e   : > { %v1501_v40 = vpop.eup %1134  ;;  %v406_v41 = vadd.f32 %v1498_v38, %v402_v33 }
  0x7f   : > { %v1504_v42 = vpop.eup %1136  ;;  %v407_v43 = vadd.f32 %v1501_v40, %v403_v35 }
  0x80   : > { %v1507_v44 = vpop.eup %1138  ;;  %v408_v45 = vadd.f32 %v1504_v42, %v404_v37 }
  0x81   : > { %v1510_v46 = vpop.eup %1140  ;;  %v409_v47 = vadd.f32 %v1507_v44, %v405_v39  ;;  %1142 = vrcp.f32 %v407_v43 }
  0x82   : > { %v410_v48 = vadd.f32 %v1510_v46, %v406_v41  ;;  %1144 = vrcp.f32 %v408_v45 }
  0x83   : > { %1146 = vrcp.f32 %v409_v47 }
  0x84   : > { %1148 = vrcp.f32 %v410_v48 }
  0x8b   : > { %v1143_v52 = vpop.eup %1142 }
  0x8c   : > { %v1145_v57 = vpop.eup %1144  ;;  %v415_v58 = vmul.f32 %v1143_v52, %v407_v43 }
  0x8d   : > { %v1147_v61 = vpop.eup %1146  ;;  %v416_v62 = vmul.f32 %v1145_v57, %v408_v45 }
  0x8e   : > { %v1149_v5 = vpop.eup %1148  ;;  %v417_v6 = vmul.f32 %v1147_v61, %v409_v47  ;;  %v419_v7 = vsub.f32 2.0, %v415_v58 }
  0x8f   : > { %v418_v8 = vmul.f32 %v1149_v5, %v410_v48  ;;  %v420_v9 = vsub.f32 2.0, %v416_v62 }
  0x90   : > { %v421_v10 = vsub.f32 2.0, %v417_v6  ;;  %v423_v11 = vmul.f32 %v1143_v52, %v419_v7 }
  0x91   : > { %v422_v14 = vsub.f32 2.0, %v418_v8  ;;  %v424_v15 = vmul.f32 %v1145_v57, %v420_v9 }
  0x92   : > { %v425_v18 = vmul.f32 %v1147_v61, %v421_v10  ;;  %v427_v20 = vsel %vm319_vm0, %v423_v11, 0.0 }
  0x93   : > { %v426_v29 = vmul.f32 %v1149_v5, %v422_v14  ;;  %v428_v31 = vsel %vm320_vm1, %v424_v15, 0.0  ;;  %v431_v33 = vmul.f32 %v1466_v19, %v427_v20  ;;  %v461_v35 = vmul.f32 %v1474_v25, %v427_v20 }
  0x94   : > { %v429_v37 = vsel %vm321_vm2, %v425_v18, 0.0  ;;  %v432_v39 = vmul.f32 %v1468_v21, %v428_v31  ;;  %v462_v1 = vmul.f32 %v1476_v26, %v428_v31  ;;  %v491_v41 = vmul.f32 %v1488_v32, %v427_v20 }
  0x95   : > { %v430_v43 = vsel %vm322_vm3, %v426_v29, 0.0  ;;  %v433_v45 = vmul.f32 %v1470_v23, %v429_v37  ;;  %v447_v2 = vmul.f32 %v1522_v50, %v431_v33  ;;  %v463_v19 = vmul.f32 %v1480_v28, %v429_v37 }
  0x96   : > { %v434_v25 = vmul.f32 %v1472_v24, %v430_v43  ;;  %v448_v3 = vmul.f32 %v1524_v51, %v432_v39  ;;  %v464_v21 = vmul.f32 %v1484_v30, %v430_v43  ;;  %v477_v26 = vmul.f32 %v1532_v55, %v461_v35 }
  0x97   : > { %v449_v32 = vmul.f32 %v1528_v53, %v433_v45  ;;  %v478_v4 = vmul.f32 %v1534_v56, %v462_v1  ;;  %v479_v47 = vmul.f32 %v1536_v59, %v463_v19  ;;  %v492_v23 = vmul.f32 %v1492_v34, %v428_v31 }
  0x98   : > { %v450_v48 = vmul.f32 %v1530_v54, %v434_v25  ;;  %v451_v28 = vadd.f32 %v448_v3, %v447_v2  ;;  %v480_v24 = vmul.f32 %v1538_v60, %v464_v21  ;;  %v493_v49 = vmul.f32 %v1495_v36, %v429_v37 }
  0x99   : > { %v481_v52 = vadd.f32 %v478_v4, %v477_v26  ;;  %v494_v30 = vmul.f32 %v1498_v38, %v430_v43  ;;  %v507_v57 = vmul.f32 %v1542_v63, %v491_v41  ;;  %v508_v58 = vmul.f32 %v1544_v0, %v492_v23 }
  0x9a   : > { %v452_v61 = vadd.f32 %v451_v28, %v449_v32  ;;  %v509_v62 = vmul.f32 %v1552_v12, %v493_v49  ;;  %v521_v34 = vmul.f32 %v1501_v40, %v427_v20  ;;  %v522_v5 = vmul.f32 %v1504_v42, %v428_v31 }
  0x9b   : > { %v482_v6 = vadd.f32 %v481_v52, %v479_v47  ;;  %v510_v7 = vmul.f32 %v1554_v13, %v494_v30  ;;  %v511_v8 = vadd.f32 %v508_v58, %v507_v57  ;;  %v523_v36 = vmul.f32 %v1507_v44, %v429_v37 }
  0x9c   : > { %v453_v9 = vadd.f32 %v452_v61, %v450_v48  ;;  %v524_v38 = vmul.f32 %v1510_v46, %v430_v43  ;;  %v537_v10 = vmul.f32 %v1556_v16, %v521_v34  ;;  %v538_v11 = vmul.f32 %v1558_v17, %v522_v5 }
  0x9d   : > { %v483_v14 = vadd.f32 %v482_v6, %v480_v24  ;;  %v512_v15 = vadd.f32 %v511_v8, %v509_v62  ;;  %v539_v18 = vmul.f32 %v1562_v22, %v523_v36  ;;  %v454_v40 = vadd.f32 %v1522_v50, %v431_v33 }
  0x9e   : > { %v540_v42 = vmul.f32 %v1564_v27, %v524_v38  ;;  %v541_v20 = vadd.f32 %v538_v11, %v537_v10  ;;  %v455_v29 = vadd.f32 %v1524_v51, %v432_v39  ;;  %v456_v44 = vadd.f32 %v1528_v53, %v433_v45  ;;  %567 = vst [vmem:[%s1609_s27] sm:$0xff] %v453_v9 }
  0x9f   : > { %v513_v31 = vadd.f32 %v512_v15, %v510_v7  ;;  %v457_v46 = vadd.f32 %v1530_v54, %v434_v25  ;;  %v484_v50 = vadd.f32 %v1532_v55, %v461_v35  ;;  %v485_v33 = vadd.f32 %v1534_v56, %v462_v1  ;;  %568 = vst [vmem:[%s1609_s27 + $0x8] sm:$0xff] %v483_v14 }
  0xa0   : > { %v542_v37 = vadd.f32 %v541_v20, %v539_v18  ;;  %v458_v43 = vadd.f32 %v455_v29, %v454_v40  ;;  %v486_v51 = vadd.f32 %v1536_v59, %v463_v19  ;;  %v487_v39 = vadd.f32 %v1538_v60, %v464_v21 }
  0xa1   : > { %v514_v53 = vadd.f32 %v1542_v63, %v491_v41  ;;  %v488_v2 = vadd.f32 %v485_v33, %v484_v50  ;;  %v515_v25 = vadd.f32 %v1544_v0, %v492_v23  ;;  %569 = vst [vmem:[%s1609_s27 + $0x10] sm:$0xff] %v513_v31  ;;  %v516_v55 = vadd.f32 %v1552_v12, %v493_v49 }
  0xa2   : > { %v543_v54 = vadd.f32 %v542_v37, %v540_v42  ;;  %v459_v45 = vadd.f32 %v458_v43, %v456_v44  ;;  %v517_v56 = vadd.f32 %v1554_v13, %v494_v30  ;;  %v544_v59 = vadd.f32 %v1556_v16, %v521_v34 }
  0xa3   : > { %v545_v60 = vadd.f32 %v1558_v17, %v522_v5  ;;  %v489_v35 = vadd.f32 %v488_v2, %v486_v51  ;;  %v518_v1 = vadd.f32 %v515_v25, %v514_v53  ;;  %v546_v41 = vadd.f32 %v1562_v22, %v523_v36 }
  0xa4   : > { %v460_v63 = vadd.f32 %v459_v45, %v457_v46  ;;  %v547_v0 = vadd.f32 %v1564_v27, %v524_v38  ;;  %570 = vst [vmem:[%s1609_s27 + $0x18] sm:$0xff] %v543_v54 }
  0xa5   : > { %v548_v19 = vadd.f32 %v545_v60, %v544_v59  ;;  %v490_v12 = vadd.f32 %v489_v35, %v487_v39  ;;  %v519_v13 = vadd.f32 %v518_v1, %v516_v55 }
  0xa6   : > { %571 = vst [vmem:[%s1609_s27 + $0x20] sm:$0xff] %v460_v63 }
  0xa7   : > { %v549_v3 = vadd.f32 %v548_v19, %v546_v41  ;;  %v520_v16 = vadd.f32 %v519_v13, %v517_v56  ;;  %572 = vst [vmem:[%s1609_s27 + $0x28] sm:$0xff] %v490_v12 }
  0xa9   : > { %v550_v17 = vadd.f32 %v549_v3, %v547_v0  ;;  %573 = vst [vmem:[%s1609_s27 + $0x30] sm:$0xff] %v520_v16 }
  0xab   : > { %574 = vst [vmem:[%s1609_s27 + $0x38] sm:$0xff] %v550_v17 }
  0xac   : > { %1191 = shalt.err (!%p1188_p13)
}
  0xad   : > { %s1192_s4 = scalar_lea.hbm %s1634_s20, 1024  ;;  %s1196_s19 = scalar_lea.hbm %s1689_s2, 2048 }
  0xae   : > { %p1193_p0 = scmp.ne.s32.totalorder %s1634_s20, %s1192_s4  ;;  %p1197_p3 = scmp.lt.u32.totalorder %s1634_s20, %s1689_s2 }
  0xaf   : > { %p1198_p12 = scmp.lt.u32.totalorder %s1196_s19, %s1192_s4  ;;  %p1200_p4 = scmp.lt.u32.totalorder %s1192_s4, %s1634_s20 }
  0xb0   : > { %p1194_p2 = pnand %p1193_p0, %p1698_p9 }
  0xb1   : > { %p1199_p8 = por %p1198_p12, %p1197_p3 }
  0xb2   : > { %p1195_p1 = pneg %p1194_p2 }
  0xb3   : > { %p1201_p11 = por %p1200_p4, %p1199_p8 }
  0xb5   : > { %p1202_p5 = pnand %p1201_p11, %p1195_p1 }
  0xb7   : > { %1205 = shalt.err (!%p1202_p5)
}
  0xb8   : > { %s1274_s21 = smov 128   ;;  %s1275_s27 = smov 8  }
  0xb9   : > { %1047 = dma.vmem_to_hbm [thread:$0]  (%p1698_p9), %s1636_s15, 1024, %s1634_s20, %s836_s25, %s1274_s21, %s1274_s21, %s1275_s27  }
  0xba PF: > { %s866_s6 = sand.u32 1, %s1244_s9   ;;  %p1699_p6 = scmp.ne.s32.totalorder %s1696_s24, 0 }
  0xbb   : > { %p1700_p7 = scmp.ge.s32.totalorder %s1264_s14, 2  ;;  %s867_s16 = scalar_lea.sflag [#allocation4], %s866_s6 }
  0xbd   : > { %p1050_p10 = pnand %p1700_p7, %p1699_p6 }
  0xbf   : > { %1239 = dma.done.wait (!%p1050_p10), %s867_s16, 1024  }
  0xc0   : > { %1241 = vsyncadd (!%p1050_p10), %s867_s16, 4294966272  ;;  %s21_s14 = sadd.s32 1, %s1264_s14   ;;  %s1701_s9 = smov %s1248_s10 }
  0xc1   : > { %p18_p13 = scmp.ge.s32.totalorder %s21_s14, 4   ;;  %s1702_s10 = smov %s1252_s11 }
  0xc2   : > { %s1703_s11 = smov %s1347_s23  ;;  %s1704_s12 = smov %s1260_s13 }
  0xc3   : > { %s1705_s13 = smov %s1707_s17  ;;  %20 = sbr.rel (!%p18_p13) target bundleno = 8 (0x8), region = 109 }
  0xca   :  { %872 = vsyncpa [#allocation3], 1 }
  0xcb   :  { %874 = vsyncpa [#allocation3 + $0x1], 1 }
  0xcc   :  { %875 = vsyncpa [#allocation6], 1 }
  0xcd   :  { %877 = vsyncpa [#allocation6 + $0x1], 1 }
  0xce   :  { %878 = vsyncpa [#allocation4], 1 }
  0xcf   :  { %880 = vsyncpa [#allocation4 + $0x1], 1 }

</bundles_post_ra>
